<compile_context>
chip_gen: v6e
topology: v6e:2x2x1
jax: 0.10.0
libtpu: 0.0.40
codegen_flags: <defaults>
</compile_context>

<pallas_src>
import functools

import jax
import jax.numpy as jnp
import numpy as np
from jax.experimental import pallas as pl
from jax.experimental.pallas import tpu as pltpu


def _conv_sws_kernel(x_ref, w_ref, shift_ref, s_ref, st_ref, o_ref,
                     *, e_lambda, inv_count, inv_n):
    # x_ref:     (1, C1, HW)  input image, channels on sublanes, spatial on lanes
    # w_ref:     (C2, C1)     conv weight with BN scale pre-folded
    # shift_ref: (C2, 1)      folded BN shift (per output channel)
    # s_ref:     (HW, 16)     one-hot pixel -> 4x4 block membership
    # st_ref:    (16, HW)     its transpose (precomputed; no in-kernel transpose)
    # o_ref:     (1, C2, HW)
    x = x_ref[0]                                                       # (C1, HW)

    # 1x1 conv (+ folded BN scale) as a lane-dense MXU matmul.
    y = jnp.dot(w_ref[...], x, preferred_element_type=jnp.float32)    # (C2, HW)
    y = y + shift_ref[...]                                             # BN shift
    y = y * jax.nn.sigmoid(y)                                          # SiLU

    # SimAM with 4x4 slicing.  Per-(channel, block) mean / sum-of-squares are
    # computed as selector matmuls (y @ S), and broadcast back to every pixel
    # via (stats @ S.T) — everything stays in the lane-dense (C2, HW) layout.
    blk_sum = jnp.dot(y, s_ref[...], preferred_element_type=jnp.float32)      # (C2, 16)
    mu_bc = jnp.dot(blk_sum * inv_count, st_ref[...],
                    preferred_element_type=jnp.float32)                       # (C2, HW)
    sq = (y - mu_bc) ** 2
    sq_sum = jnp.dot(sq, s_ref[...], preferred_element_type=jnp.float32)      # (C2, 16)
    denom = 4.0 * (sq_sum * inv_n + e_lambda)                                 # (C2, 16)
    # Exact reciprocal, but only on 16*C2 elements (vs H*W*C2 divides before).
    inv_denom = pl.reciprocal(denom)
    inv_bc = jnp.dot(inv_denom, st_ref[...],
                     preferred_element_type=jnp.float32)                      # (C2, HW)
    att = sq * inv_bc + 0.5
    out = y * jax.nn.sigmoid(att)

    o_ref[0] = out.astype(o_ref.dtype)


def conv_sws_4x4(x_nchw, w_conv, gamma, beta, run_mean, run_var,
                 *, bn_eps=1e-5, e_lambda=1e-4):
    N, C1, H, W = x_nchw.shape
    C2 = w_conv.shape[0]
    # k=1, s=1, autopad(1)=0, g=1 => pointwise conv; spatial dims unchanged.
    assert H % 4 == 0 and W % 4 == 0  # TODO(synk): pad/crop path for H,W not multiples of 4 (glue-level, never hit here)
    bh, bw = H // 4, W // 4
    HW = H * W
    n = bh * bw - 1  # TODO(synk): n == 0 when H == 4 or W == 4 -> reference divides by zero; guard upstream if needed

    # Native NCHW layout: flattening (H, W) -> HW is free; no transposes.
    x_flat = x_nchw.reshape(N, C1, HW).astype(jnp.float32)

    # Fold BN (inference) scale into the conv weight; only the shift remains.
    inv_std = 1.0 / jnp.sqrt(run_var + bn_eps)
    scale = gamma * inv_std                                            # (C2,)
    w_mat = (w_conv.reshape(C2, C1) * scale[:, None]).astype(jnp.float32)
    shift = (beta - run_mean * scale).reshape(C2, 1).astype(jnp.float32)

    # 0/1 selector: pixel (h, w) -> block (h // bh) * 4 + (w // bw).
    bidx = ((jnp.arange(H) // bh)[:, None] * 4
            + (jnp.arange(W) // bw)[None, :]).reshape(HW)
    sel = jax.nn.one_hot(bidx, 16, dtype=jnp.float32)                  # (HW, 16)
    sel_t = sel.T                                                      # (16, HW)

    kernel = functools.partial(_conv_sws_kernel,
                               e_lambda=float(e_lambda),
                               inv_count=1.0 / float(bh * bw),
                               inv_n=1.0 / float(n))

    out_flat = pl.pallas_call(
        kernel,
        out_shape=jax.ShapeDtypeStruct((N, C2, HW), jnp.float32),
        grid_spec=pltpu.PrefetchScalarGridSpec(
            num_scalar_prefetch=0,
            grid=(N,),  # batch axis: 'parallel' so v7x's 2 TCs both get work
            in_specs=[
                pl.BlockSpec((1, C1, HW), lambda i: (i, 0, 0)),
                pl.BlockSpec((C2, C1), lambda i: (0, 0)),
                pl.BlockSpec((C2, 1), lambda i: (0, 0)),
                pl.BlockSpec((HW, 16), lambda i: (0, 0)),
                pl.BlockSpec((16, HW), lambda i: (0, 0)),
            ],
            out_specs=pl.BlockSpec((1, C2, HW), lambda i: (i, 0, 0)),
        ),
        compiler_params=pltpu.CompilerParams(
            dimension_semantics=("parallel",)),
    )(x_flat, w_mat, shift, sel, sel_t)

    return out_flat.reshape(N, C2, H, W)


def reference(x_nchw, w_conv, gamma, beta, run_mean, run_var,
              *, bn_eps=1e-5, e_lambda=1e-4):
    """Pure-JAX reference mirroring the PyTorch forward (NCHW)."""
    N, C1, H, W = x_nchw.shape
    C2 = w_conv.shape[0]
    y = jnp.einsum('nchw,oc->nohw', x_nchw, w_conv.reshape(C2, C1))
    y = (y - run_mean[None, :, None, None]) / jnp.sqrt(
        run_var[None, :, None, None] + bn_eps)
    y = y * gamma[None, :, None, None] + beta[None, :, None, None]
    y = y * jax.nn.sigmoid(y)                       # SiLU
    bh, bw = H // 4, W // 4
    yb = y.reshape(N, C2, 4, bh, 4, bw)
    mu = yb.mean(axis=(3, 5), keepdims=True)
    sq = (yb - mu) ** 2
    n = bh * bw - 1
    att = sq / (4.0 * (sq.sum(axis=(3, 5), keepdims=True) / n + e_lambda)) + 0.5
    out = yb * jax.nn.sigmoid(att)
    return out.reshape(N, C2, H, W)


if __name__ == "__main__":
    key = jax.random.PRNGKey(0)
    k_x, k_w, k_g, k_b, k_m, k_v = jax.random.split(key, 6)

    N, C1, C2, H, W = 2, 4, 8, 16, 16

    x = jax.random.normal(k_x, (N, C1, H, W), dtype=jnp.float32)
    # nn.Conv2d(c1, c2, 1, bias=False) weight shape: (C2, C1, 1, 1)
    w_conv = jax.random.normal(k_w, (C2, C1, 1, 1), dtype=jnp.float32) * 0.3
    gamma = 1.0 + 0.1 * jax.random.normal(k_g, (C2,), dtype=jnp.float32)
    beta = 0.1 * jax.random.normal(k_b, (C2,), dtype=jnp.float32)
    run_mean = 0.1 * jax.random.normal(k_m, (C2,), dtype=jnp.float32)
    run_var = jnp.abs(jax.random.normal(k_v, (C2,), dtype=jnp.float32)) + 0.5

    out = conv_sws_4x4(x, w_conv, gamma, beta, run_mean, run_var)
    out = jax.block_until_ready(out)

    ref = reference(x, w_conv, gamma, beta, run_mean, run_var)
    np.testing.assert_allclose(np.asarray(out), np.asarray(ref),
                               rtol=1e-5, atol=1e-5)
    print("KERNEL_OK")
</pallas_src>

<mosaic_0001>
module attributes {stable_mosaic.version = 11 : i64} {
  func.func @_conv_sws_kernel(%arg0: i32, %arg1: memref<1x4x256xf32, #tpu.memory_space<vmem>>, %arg2: memref<8x4xf32, #tpu.memory_space<vmem>>, %arg3: memref<8x1xf32, #tpu.memory_space<vmem>>, %arg4: memref<256x16xf32, #tpu.memory_space<vmem>>, %arg5: memref<16x256xf32, #tpu.memory_space<vmem>>, %arg6: memref<1x8x256xf32, #tpu.memory_space<vmem>>) attributes {dimension_semantics = [#tpu.dimension_semantics<parallel>], iteration_bounds = array<i64: 2>, scalar_prefetch = 0 : i64, scratch_operands = 0 : i64, tpu.core_type = #tpu.core_type<tc>, window_params = [{transform_indices = @transform_0, window_bounds = array<i64: 1, 4, 256>}, {pipeline_mode = #tpu.pipeline_mode<synchronous>, transform_indices = @transform_1, window_bounds = array<i64: 8, 4>}, {pipeline_mode = #tpu.pipeline_mode<synchronous>, transform_indices = @transform_2, window_bounds = array<i64: 8, 1>}, {pipeline_mode = #tpu.pipeline_mode<synchronous>, transform_indices = @transform_3, window_bounds = array<i64: 256, 16>}, {pipeline_mode = #tpu.pipeline_mode<synchronous>, transform_indices = @transform_4, window_bounds = array<i64: 16, 256>}, {transform_indices = @transform_5, window_bounds = array<i64: 1, 8, 256>}]} {
    %c0 = arith.constant 0 : index
    %c0_0 = arith.constant 0 : index
    %c0_1 = arith.constant 0 : index
    %0 = vector.load %arg1[%c0, %c0_0, %c0_1] : memref<1x4x256xf32, #tpu.memory_space<vmem>>, vector<1x4x256xf32>
    %1 = vector.shape_cast %0 : vector<1x4x256xf32> to vector<4x256xf32>
    %c0_2 = arith.constant 0 : index
    %c0_3 = arith.constant 0 : index
    %2 = vector.load %arg2[%c0_2, %c0_3] : memref<8x4xf32, #tpu.memory_space<vmem>>, vector<8x4xf32>
    %cst = arith.constant dense<0.000000e+00> : vector<8x256xf32>
    %3 = tpu.matmul %2, %1, %cst {dimension_numbers = #tpu.dot_dimension_numbers<[1], [0], [0], [1], [0, 0, 1, 1], [], []>} : vector<8x4xf32>, vector<4x256xf32>, vector<8x256xf32> -> vector<8x256xf32>
    %c0_4 = arith.constant 0 : index
    %c0_5 = arith.constant 0 : index
    %4 = vector.load %arg3[%c0_4, %c0_5] : memref<8x1xf32, #tpu.memory_space<vmem>>, vector<8x1xf32>
    %5 = vector.broadcast %4 : vector<8x1xf32> to vector<8x256xf32>
    %6 = arith.addf %3, %5 : vector<8x256xf32>
    %7 = arith.negf %6 : vector<8x256xf32>
    %8 = math.exp %7 : vector<8x256xf32>
    %cst_6 = arith.constant 1.000000e+00 : f32
    %9 = vector.broadcast %cst_6 : f32 to vector<8x256xf32>
    %10 = arith.addf %9, %8 : vector<8x256xf32>
    %11 = arith.divf %9, %10 : vector<8x256xf32>
    %12 = arith.mulf %6, %11 : vector<8x256xf32>
    %c0_7 = arith.constant 0 : index
    %c0_8 = arith.constant 0 : index
    %13 = vector.load %arg4[%c0_7, %c0_8] : memref<256x16xf32, #tpu.memory_space<vmem>>, vector<256x16xf32>
    %cst_9 = arith.constant dense<0.000000e+00> : vector<8x16xf32>
    %14 = tpu.matmul %12, %13, %cst_9 {dimension_numbers = #tpu.dot_dimension_numbers<[1], [0], [0], [1], [0, 0, 1, 1], [], []>} : vector<8x256xf32>, vector<256x16xf32>, vector<8x16xf32> -> vector<8x16xf32>
    %cst_10 = arith.constant 6.250000e-02 : f32
    %15 = vector.broadcast %cst_10 : f32 to vector<8x16xf32>
    %16 = arith.mulf %14, %15 : vector<8x16xf32>
    %c0_11 = arith.constant 0 : index
    %c0_12 = arith.constant 0 : index
    %17 = vector.load %arg5[%c0_11, %c0_12] : memref<16x256xf32, #tpu.memory_space<vmem>>, vector<16x256xf32>
    %cst_13 = arith.constant dense<0.000000e+00> : vector<8x256xf32>
    %18 = tpu.matmul %16, %17, %cst_13 {dimension_numbers = #tpu.dot_dimension_numbers<[1], [0], [0], [1], [0, 0, 1, 1], [], []>} : vector<8x16xf32>, vector<16x256xf32>, vector<8x256xf32> -> vector<8x256xf32>
    %19 = arith.subf %12, %18 : vector<8x256xf32>
    %20 = arith.mulf %19, %19 : vector<8x256xf32>
    %c0_14 = arith.constant 0 : index
    %c0_15 = arith.constant 0 : index
    %21 = vector.load %arg4[%c0_14, %c0_15] : memref<256x16xf32, #tpu.memory_space<vmem>>, vector<256x16xf32>
    %cst_16 = arith.constant dense<0.000000e+00> : vector<8x16xf32>
    %22 = tpu.matmul %20, %21, %cst_16 {dimension_numbers = #tpu.dot_dimension_numbers<[1], [0], [0], [1], [0, 0, 1, 1], [], []>} : vector<8x256xf32>, vector<256x16xf32>, vector<8x16xf32> -> vector<8x16xf32>
    %cst_17 = arith.constant 0.0666666701 : f32
    %23 = vector.broadcast %cst_17 : f32 to vector<8x16xf32>
    %24 = arith.mulf %22, %23 : vector<8x16xf32>
    %cst_18 = arith.constant 9.99999974E-5 : f32
    %25 = vector.broadcast %cst_18 : f32 to vector<8x16xf32>
    %26 = arith.addf %24, %25 : vector<8x16xf32>
    %cst_19 = arith.constant 4.000000e+00 : f32
    %27 = vector.broadcast %cst_19 : f32 to vector<8x16xf32>
    %28 = arith.mulf %27, %26 : vector<8x16xf32>
    %29 = tpu.reciprocal %28 : vector<8x16xf32> -> vector<8x16xf32>
    %c0_20 = arith.constant 0 : index
    %c0_21 = arith.constant 0 : index
    %30 = vector.load %arg5[%c0_20, %c0_21] : memref<16x256xf32, #tpu.memory_space<vmem>>, vector<16x256xf32>
    %cst_22 = arith.constant dense<0.000000e+00> : vector<8x256xf32>
    %31 = tpu.matmul %29, %30, %cst_22 {dimension_numbers = #tpu.dot_dimension_numbers<[1], [0], [0], [1], [0, 0, 1, 1], [], []>} : vector<8x16xf32>, vector<16x256xf32>, vector<8x256xf32> -> vector<8x256xf32>
    %32 = arith.mulf %20, %31 : vector<8x256xf32>
    %cst_23 = arith.constant 5.000000e-01 : f32
    %33 = vector.broadcast %cst_23 : f32 to vector<8x256xf32>
    %34 = arith.addf %32, %33 : vector<8x256xf32>
    %35 = arith.negf %34 : vector<8x256xf32>
    %36 = math.exp %35 : vector<8x256xf32>
    %cst_24 = arith.constant 1.000000e+00 : f32
    %37 = vector.broadcast %cst_24 : f32 to vector<8x256xf32>
    %38 = arith.addf %37, %36 : vector<8x256xf32>
    %39 = arith.divf %37, %38 : vector<8x256xf32>
    %40 = arith.mulf %12, %39 : vector<8x256xf32>
    %c0_25 = arith.constant 0 : index
    %c0_26 = arith.constant 0 : index
    %c0_27 = arith.constant 0 : index
    %41 = vector.load %arg6[%c0_25, %c0_26, %c0_27] : memref<1x8x256xf32, #tpu.memory_space<vmem>>, vector<1x8x256xf32>
    %42 = vector.shape_cast %41 : vector<1x8x256xf32> to vector<8x256xf32>
    %43 = vector.shape_cast %40 : vector<8x256xf32> to vector<1x8x256xf32>
    tpu.vector_store %arg6[%c0_25, %c0_26, %c0_27], %43 {strides = array<i32>} : memref<1x8x256xf32, #tpu.memory_space<vmem>>, vector<1x8x256xf32>,
    return
  }
  func.func @transform_0(%arg0: i32) -> (i32, i32, i32) {
    %c0_i32 = arith.constant 0 : i32
    %c0_i32_0 = arith.constant 0 : i32
    %c0_i32_1 = arith.constant 0 : i32
    return %arg0, %c0_i32, %c0_i32_0 : i32, i32, i32
  }
  func.func @transform_1(%arg0: i32) -> (i32, i32) {
    %c0_i32 = arith.constant 0 : i32
    %c0_i32_0 = arith.constant 0 : i32
    %c0_i32_1 = arith.constant 0 : i32
    return %c0_i32, %c0_i32_0 : i32, i32
  }
  func.func @transform_2(%arg0: i32) -> (i32, i32) {
    %c0_i32 = arith.constant 0 : i32
    %c0_i32_0 = arith.constant 0 : i32
    %c0_i32_1 = arith.constant 0 : i32
    return %c0_i32, %c0_i32_0 : i32, i32
  }
  func.func @transform_3(%arg0: i32) -> (i32, i32) {
    %c0_i32 = arith.constant 0 : i32
    %c0_i32_0 = arith.constant 0 : i32
    %c0_i32_1 = arith.constant 0 : i32
    return %c0_i32, %c0_i32_0 : i32, i32
  }
  func.func @transform_4(%arg0: i32) -> (i32, i32) {
    %c0_i32 = arith.constant 0 : i32
    %c0_i32_0 = arith.constant 0 : i32
    %c0_i32_1 = arith.constant 0 : i32
    return %c0_i32, %c0_i32_0 : i32, i32
  }
  func.func @transform_5(%arg0: i32) -> (i32, i32, i32) {
    %c0_i32 = arith.constant 0 : i32
    %c0_i32_0 = arith.constant 0 : i32
    %c0_i32_1 = arith.constant 0 : i32
    return %arg0, %c0_i32, %c0_i32_0 : i32, i32, i32
  }
}

</mosaic_0001>

<bundles_post_ra>
// kernel: tpu_custom_call.1
= control target key start
LH: loop header
LB: loop body
LE: loop exit
PB: predicated region body
PF: predicated region fallthrough
CT: control target
= control target key end

     0   :  { %10 = vsyncpa [#allocation3], 0  ;;  %s1348_s0 = inlined_call_operand.vmem [shape: f32[2,4,256], index: 0, kind: input, shape index: {}]   ;;  %s1349_s1 = inlined_call_operand.vmem [shape: f32[8,4], index: 1, kind: input, shape index: {}]   ;;  %s1350_s2 = inlined_call_operand.vmem [shape: f32[8,1], index: 2, kind: input, shape index: {}]   ;;  %s1351_s3 = inlined_call_operand.vmem [shape: f32[256,16], index: 3, kind: input, shape index: {}]   ;;  %s1352_s4 = inlined_call_operand.vmem [shape: f32[16,256], index: 4, kind: input, shape index: {}]   ;;  %s1353_s5 = inlined_call_operand.hbm [shape: f32[2,8,256], index: 5, kind: output, shape index: {}]  }
   0x1   :  { %12 = vsyncpa [#allocation3 + $0x1], 0  ;;  %s1004_s18 = smov 0   ;;  %s1006_s19 = smov 0  }
   0x2   :  { %s1008_s20 = smov 0   ;;  %s1010_s21 = smov 0  }
   0x3 LB: > { %s1025_s22 = sadd.s32 4294967295, %s969_s21   ;;  %s755_s23 = sadd.s32 4294967294, %s969_s21   ;;  %s969_s21 = sphi %s1010_s21, %s1359_s21   ;;  %s965_s20 = sphi %s1008_s20, %s1358_s20   ;;  %s961_s19 = sphi %s1006_s19, %s1357_s19   ;;  %s957_s18 = sphi %s1004_s18, %s1356_s18  }
   0x4   : > { %s1029_s24 = sadd.s32 1, %s969_s21   ;;  %s135_s25 = sadd.s32 1, %s965_s20 }
   0x5   : > { %s132_s26 = ssub.s32 %s969_s21, %s1029_s24  ;;  %p145_p0 = scmp.ne.s32.totalorder %s965_s20, %s961_s19 }
   0x6   : > { %p133_p1 = scmp.eq.s32.totalorder %s132_s26, 0  ;;  %p146_p2 = scmp.eq.s32.totalorder %s1025_s22, 1 }
   0x7   : > { %p151_p3 = scmp.ne.s32.totalorder %s961_s19, %s957_s18  ;;  %p152_p4 = scmp.eq.s32.totalorder %s755_s23, 1 }
   0x8   : > { %s1040_s27 = scalar_select %p133_p1, %s965_s20, %s135_s25  }
   0x9   : > { %p1042_p5 = por %p146_p2, %p145_p0  ;;  %p1046_p6 = por %p152_p4, %p151_p3 }
   0xa   : > { %p758_p7 = scmp.ge.s32.totalorder %s969_s21, 1  ;;  %p190_p8 = scmp.lt.s32.totalorder %s969_s21, 3 }
   0xc   : > { %p191_p9 = pnand %p758_p7, %p190_p8 }
   0xd   : > { %p218_p10 = scmp.lt.s32.totalorder (!%p191_p9), %s1025_s22, 1  ;;  %s215_s6 = sand.u32 (!%p191_p9), 1, %s961_s19  }
   0xe   : > { %194 = sbr.rel (%p191_p9) target bundleno = 1122 (0x462), region = 40  ;;  %s682_s14 = scalar_lea.sflag (!%p191_p9), [#allocation3], %s215_s6 }
  0x13   : > { %v971_v0 = vmov 0.0   ;;  %v972_v1 = vmov 0   ;;  %v225_v2 = vld [vmem:[%s1350_s2] sm:$0xff]  ;;  %s219_s7 = scalar_select %p218_p10, %s1025_s22, 1  ;;  %vm237_vm0 = vcmask 1043456   ;;  %vm233_vm1 = vcmask 31744  }
  0x14   : > { %306 = vmatprep.mubr.f32.mxu0 %v971_v0  ;;  %889 = vset.pattern.permute.xlu0 %v972_v1  ;;  %v224_v5 = vld [vmem:[%s1349_s1] sm:$0xff]  ;;  %v1068_v6 = vld [vmem:[%s1351_s3 + $0xf8] sm:$0xff]  ;;  %v1080_v8 = vld [vmem:[%s1351_s3 + $0xf0] sm:$0xff]  ;;  %vm434_vm2 = vcmask 130048  }
  0x15   : > { %228 = vperm.xlu0 %889, %v225_v2   ;;  %s776_s8 = sshll.u32 %s219_s7, 3  ;;  %778 = vmatprep.subr.mxu1 %v1068_v6  ;;  %v1074_v7 = vld [vmem:[%s1351_s3 + $0x78] sm:$0xff]  ;;  %v1086_v9 = vld [vmem:[%s1351_s3 + $0x70] sm:$0xff]  ;;  %v1092_v10 = vld [vmem:[%s1351_s3 + $0xe8] sm:$0xff]  ;;  %s759_s7 = sshll.u32 %s215_s6, 4 }
  0x16   : > { %s222_s11 = scalar_lea.vmem %s1348_s0, %s776_s8  ;;  %779 = vmatpush3.msra.mxu1 %v1074_v7  ;;  %v1098_v11 = vld [vmem:[%s1351_s3 + $0x68] sm:$0xff]  ;;  %v1104_v12 = vld [vmem:[%s1351_s3 + $0xe0] sm:$0xff]  ;;  %v1116_v14 = vld [vmem:[%s1351_s3 + $0xd8] sm:$0xff]  ;;  %s777_s8 = sshll.u32 %s1025_s22, 8 }
  0x17   : > { %v223_v3 = vld [vmem:[%s222_s11] sm:$0xff]  ;;  %780 = vmatprep.subr.mxu1 %v1080_v8  ;;  %v1122_v15 = vld [vmem:[%s1351_s3 + $0x58] sm:$0xff]  ;;  %v1128_v16 = vld [vmem:[%s1351_s3 + $0xd0] sm:$0xff]  ;;  %s217_s9 = scalar_lea.vmem [#allocation2], %s759_s7  ;;  %s694_s13 = scalar_lea.hbm %s1353_s5, %s777_s8 }
  0x18   : > { %v232_v4 = vcombine.high %v223_v3, %v223_v3  ;;  %781 = vmatpush3.msra.mxu1 %v1086_v9  ;;  %v1110_v13 = vld [vmem:[%s1351_s3 + $0x60] sm:$0xff]  ;;  %v1134_v17 = vld [vmem:[%s1351_s3 + $0x50] sm:$0xff]  ;;  %v1140_v18 = vld [vmem:[%s1351_s3 + $0xc8] sm:$0xff]  ;;  %s696_s10 = sshll.u32 %s217_s9, 4  ;;  %s973_s22 = smov [#allocation2]   ;;  %s697_s10 = int_to_ptr.vmem [resolvable:$true] %s696_s10 }
  0x19   : > { %782 = vmatprep.subr.mxu1 %v1092_v10  ;;  %v1146_v19 = vld [vmem:[%s1351_s3 + $0x48] sm:$0xff]  ;;  %v1152_v20 = vld [vmem:[%s1351_s3 + $0xc0] sm:$0xff]  ;;  %v1164_v22 = vld [vmem:[%s1351_s3 + $0xb8] sm:$0xff]  ;;  %s909_s15 = scalar_lea.vmem %s697_s10, 256  ;;  %s913_s16 = sshll.u32 %s973_s22, 4  ;;  %s914_s16 = int_to_ptr.vmem [resolvable:$false] %s913_s16 }
  0x1a   : > { %762 = vmatprep.subr.msk.mxu0 %vm237_vm0, %v232_v4  ;;  %783 = vmatpush3.msra.mxu1 %v1098_v11  ;;  %v1158_v21 = vld [vmem:[%s1351_s3 + $0x40] sm:$0xff]  ;;  %v1170_v23 = vld [vmem:[%s1351_s3 + $0x38] sm:$0xff]  ;;  %v1176_v24 = vld [vmem:[%s1351_s3 + $0xb0] sm:$0xff]  ;;  %p910_p11 = scmp.ne.s32.totalorder %s697_s10, %s909_s15  ;;  %s915_s17 = scalar_lea.vmem %s914_s16, 512 }
  0x1b   : > { %763 = vmatpush1.msk.msra.mxu0 %vm237_vm0, %v223_v3  ;;  %784 = vmatprep.subr.mxu1 %v1104_v12  ;;  %v1182_v25 = vld [vmem:[%s1351_s3 + $0x30] sm:$0xff]  ;;  %v1188_v26 = vld [vmem:[%s1351_s3 + $0xa8] sm:$0xff]  ;;  %v1200_v28 = vld [vmem:[%s1351_s3 + $0xa0] sm:$0xff]  ;;  %p916_p0 = scmp.lt.s32.totalorder %s697_s10, %s914_s16  ;;  %p917_p1 = scmp.lt.s32.totalorder %s915_s17, %s909_s15 }
  0x1c   : > { %764 = vmatmul.mubr.msk.f32.vlgmr.msra.gmra.mxu0 %vm233_vm1, %v224_v5  ;;  %785 = vmatpush3.msra.mxu1 %v1110_v13  ;;  %v1194_v27 = vld [vmem:[%s1351_s3 + $0x28] sm:$0xff]  ;;  %v1206_v29 = vld [vmem:[%s1351_s3 + $0x20] sm:$0xff]  ;;  %v1212_v30 = vld [vmem:[%s1351_s3 + $0x98] sm:$0xff]  ;;  %p911_p12 = pnand %p910_p11, %p1042_p5 }
  0x1d   : > { %502 = vmatprep.mubr.f32.mxu0 %v971_v0  ;;  %786 = vmatprep.subr.mxu1 %v1116_v14  ;;  %v1218_v31 = vld [vmem:[%s1351_s3 + $0x18] sm:$0xff]  ;;  %v1224_v32 = vld [vmem:[%s1351_s3 + $0x90] sm:$0xff]  ;;  %v1236_v34 = vld [vmem:[%s1351_s3 + $0x88] sm:$0xff]  ;;  %p918_p2 = por %p917_p1, %p916_p0 }
  0x1e   : > { %787 = vmatpush3.msra.mxu1 %v1122_v15  ;;  %v1230_v33 = vld [vmem:[%s1351_s3 + $0x10] sm:$0xff]  ;;  %v1242_v35 = vld [vmem:[%s1351_s3 + $0x8] sm:$0xff]  ;;  %v1248_v36 = vld [vmem:[%s1351_s3 + $0x80] sm:$0xff]  ;;  %p912_p13 = pneg %p911_p12 }
  0x1f   : > { %788 = vmatprep.subr.mxu1 %v1128_v16  ;;  %v1253_v37 = vld [vmem:[%s1351_s3] sm:$0xff]  ;;  %v433_v53 = vld [vmem:[%s1352_s4 + $0x18] sm:$0xff]  ;;  %v432_v54 = vld [vmem:[%s1352_s4 + $0x10] sm:$0xff] }
  0x20   : > { %789 = vmatpush3.msra.mxu1 %v1134_v17  ;;  %466 = vmatprep.subr.mxu0 %v433_v53  ;;  %v431_v55 = vld [vmem:[%s1352_s4 + $0x8] sm:$0xff]  ;;  %v430_v56 = vld [vmem:[%s1352_s4] sm:$0xff]  ;;  %p919_p3 = pnand %p918_p2, %p912_p13 }
  0x21   : > { %790 = vmatprep.subr.mxu1 %v1140_v18  ;;  %467 = vmatpush1.msra.mxu0 %v432_v54 }
  0x22   : > { %791 = vmatpush3.msra.mxu1 %v1146_v19  ;;  %468 = vmatprep.subr.mxu0 %v431_v55 }
  0x23   : > { %792 = vmatprep.subr.mxu1 %v1152_v20  ;;  %469 = vmatpush1.msra.mxu0 %v430_v56 }
  0x24   : > { %793 = vmatpush3.msra.mxu1 %v1158_v21  ;;  %813 = vmatprep.subr.mxu0 %v1068_v6 }
  0x25   : > { %794 = vmatprep.subr.mxu1 %v1164_v22 }
  0x26   : > { %795 = vmatpush3.msra.mxu1 %v1170_v23 }
  0x27   : > { %796 = vmatprep.subr.mxu1 %v1176_v24 }
  0x28   : > { %797 = vmatpush3.msra.mxu1 %v1182_v25 }
  0x29   : > { %798 = vmatprep.subr.mxu1 %v1188_v26 }
  0x2a   : > { %799 = vmatpush3.msra.mxu1 %v1194_v27 }
  0x2b   : > { %800 = vmatprep.subr.mxu1 %v1200_v28 }
  0x2c   : > { %801 = vmatpush3.msra.mxu1 %v1206_v29 }
  0x2d   : > { %802 = vmatprep.subr.mxu1 %v1212_v30 }
  0x2e   : > { %803 = vmatpush3.msra.mxu1 %v1218_v31 }
  0x2f   : > { %804 = vmatprep.subr.mxu1 %v1224_v32 }
  0x30   : > { %805 = vmatpush3.msra.mxu1 %v1230_v33 }
  0x31   : > { %806 = vmatprep.subr.mxu1 %v1236_v34 }
  0x32   : > { %807 = vmatpush3.msra.mxu1 %v1242_v35 }
  0x33   : > { %808 = vmatprep.subr.mxu1 %v1248_v36 }
  0x34   : > { %809 = vmatpush3.msra.mxu1 %v1253_v37 }
  0x35   : > { %618 = vmatprep.subr.mxu1 %v433_v53 }
  0x90   : > { %v229_v38 = vpop.permute.xlu0 %228 }
  0xdc   : > { %v308_v39 = vpop.f32.mrf.mxu0 }
  0xdd   : > { %v309_v40 = vadd.f32 %v308_v39, %v229_v38 }
  0xde   : > { %v310_v41 = vpop.f32.mrf.mxu0 }
  0xdf   : > { %v765_v42 = vmul.f32 -1.442695, %v309_v40  ;;  %v311_v43 = vadd.f32 %v310_v41, %v229_v38 }
  0xe1   : > { %891 = vpow2.f32 %v765_v42  ;;  %v766_v44 = vmul.f32 -1.442695, %v311_v43 }
  0xe3   : > { %893 = vpow2.f32 %v766_v44 }
  0xee   : > { %v892_v45 = vpop.eup %891 }
  0xef   : > { %v319_v46 = vadd.f32 1.0, %v892_v45 }
  0xf0   : > { %v894_v47 = vpop.eup %893 }
  0xf1   : > { %v320_v48 = vadd.f32 1.0, %v894_v47  ;;  %895 = vrcp.f32 %v319_v46 }
  0xf3   : > { %897 = vrcp.f32 %v320_v48 }
  0xfe   : > { %v896_v49 = vpop.eup %895 }
  0xff   : > { %v1259_v52 = vmul.f32 %v896_v49, %v309_v40 }
 0x100   : > { %v898_v50 = vpop.eup %897 }
 0x101   : > { %v1257_v51 = vmul.f32 %v898_v50, %v311_v43 }
 0x103   : > { %423 = vmatprep.mubr.f32.mxu1 %v1257_v51 }
 0x104   : > { %424 = vmatmul.mubr.f32.vlgmr.msra.gmra.mxu1 %v1259_v52 }
 0x105   : > { %654 = vmatprep.mubr.f32.mxu1 %v971_v0  ;;  %619 = vmatpush1.msra.mxu1 %v432_v54 }
 0x106   : > { %620 = vmatprep.subr.mxu1 %v431_v55 }
 0x107   : > { %621 = vmatpush1.msra.mxu1 %v430_v56 }
 0x1c4   : > { %v810_v57 = vpop.f32.mrf.mxu1 }
 0x1c6   : > { %v811_v58 = vpop.f32.mrf.mxu1 }
 0x1c7   : > { %v812_v59 = vadd.f32 %v811_v58, %v810_v57 }
 0x1c9   : > { %v429_v60 = vmul.f32 0.0625, %v812_v59 }
 0x1cb   : > { %767 = vmatmul.mubr.msk.f32.vlgmr.msra.gmra.mxu0 %vm434_vm2, %v429_v60 }
 0x1cc   : > { %814 = vmatpush3.msra.mxu0 %v1074_v7 }
 0x1cd   : > { %815 = vmatprep.subr.mxu0 %v1080_v8 }
 0x1ce   : > { %816 = vmatpush3.msra.mxu0 %v1086_v9 }
 0x1cf   : > { %817 = vmatprep.subr.mxu0 %v1092_v10 }
 0x1d0   : > { %818 = vmatpush3.msra.mxu0 %v1098_v11 }
 0x1d1   : > { %819 = vmatprep.subr.mxu0 %v1104_v12 }
 0x1d2   : > { %820 = vmatpush3.msra.mxu0 %v1110_v13 }
 0x1d3   : > { %821 = vmatprep.subr.mxu0 %v1116_v14 }
 0x1d4   : > { %822 = vmatpush3.msra.mxu0 %v1122_v15 }
 0x1d5   : > { %823 = vmatprep.subr.mxu0 %v1128_v16 }
 0x1d6   : > { %824 = vmatpush3.msra.mxu0 %v1134_v17 }
 0x1d7   : > { %825 = vmatprep.subr.mxu0 %v1140_v18 }
 0x1d8   : > { %826 = vmatpush3.msra.mxu0 %v1146_v19 }
 0x1d9   : > { %827 = vmatprep.subr.mxu0 %v1152_v20 }
 0x1da   : > { %828 = vmatpush3.msra.mxu0 %v1158_v21 }
 0x1db   : > { %829 = vmatprep.subr.mxu0 %v1164_v22 }
 0x1dc   : > { %830 = vmatpush3.msra.mxu0 %v1170_v23 }
 0x1dd   : > { %831 = vmatprep.subr.mxu0 %v1176_v24 }
 0x1de   : > { %832 = vmatpush3.msra.mxu0 %v1182_v25 }
 0x1df   : > { %833 = vmatprep.subr.mxu0 %v1188_v26 }
 0x1e0   : > { %834 = vmatpush3.msra.mxu0 %v1194_v27 }
 0x1e1   : > { %835 = vmatprep.subr.mxu0 %v1200_v28 }
 0x1e2   : > { %836 = vmatpush3.msra.mxu0 %v1206_v29 }
 0x1e3   : > { %837 = vmatprep.subr.mxu0 %v1212_v30 }
 0x1e4   : > { %838 = vmatpush3.msra.mxu0 %v1218_v31 }
 0x1e5   : > { %839 = vmatprep.subr.mxu0 %v1224_v32 }
 0x1e6   : > { %840 = vmatpush3.msra.mxu0 %v1230_v33 }
 0x1e7   : > { %841 = vmatprep.subr.mxu0 %v1236_v34 }
 0x1e8   : > { %842 = vmatpush3.msra.mxu0 %v1242_v35 }
 0x1e9   : > { %843 = vmatprep.subr.mxu0 %v1248_v36 }
 0x1ea   : > { %844 = vmatpush3.msra.mxu0 %v1253_v37 }
 0x28b   : > { %v504_v61 = vpop.f32.mrf.mxu0 }
 0x28c   : > { %v509_v62 = vsub.f32 %v1259_v52, %v504_v61 }
 0x28d   : > { %v506_v63 = vpop.f32.mrf.mxu0 }
 0x28e   : > { %v510_v0 = vsub.f32 %v1257_v51, %v506_v63  ;;  %v511_v2 = vmul.f32 %v509_v62, %v509_v62 }
 0x290   : > { %v512_v1 = vmul.f32 %v510_v0, %v510_v0 }
 0x292   : > { %577 = vmatprep.mubr.f32.mxu0 %v512_v1 }
 0x293   : > { %578 = vmatmul.mubr.f32.vlgmr.msra.gmra.mxu0 %v511_v2 }
 0x353   : > { %v845_v3 = vpop.f32.mrf.mxu0 }
 0x355   : > { %v846_v4 = vpop.f32.mrf.mxu0 }
 0x356   : > { %v847_v5 = vadd.f32 %v846_v4, %v845_v3 }
 0x358   : > { %v583_v6 = vmul.f32 0.06666667, %v847_v5 }
 0x35a   : > { %v584_v7 = vadd.f32 0.0001, %v583_v6 }
 0x35c   : > { %v585_v8 = vmul.f32 4.0, %v584_v7 }
 0x35e   : > { %899 = vrcp.f32 %v585_v8 }
 0x36b   : > { %v900_v9 = vpop.eup %899 }
 0x36c   : > { %768 = vmatmul.mubr.msk.f32.vlgmr.msra.gmra.mxu1 %vm434_vm2, %v900_v9 }
 0x42c   : > { %v656_v10 = vpop.f32.mrf.mxu1 }
 0x42d   : > { %v661_v11 = vmul.f32 %v656_v10, %v511_v2 }
 0x42e   : > { %v658_v12 = vpop.f32.mrf.mxu1 }
 0x42f   : > { %v663_v13 = vadd.f32 0.5, %v661_v11  ;;  %v662_v14 = vmul.f32 %v658_v12, %v512_v1 }
 0x431   : > { %v769_v15 = vmul.f32 -1.442695, %v663_v13  ;;  %v664_v16 = vadd.f32 0.5, %v662_v14 }
 0x433   : > { %901 = vpow2.f32 %v769_v15  ;;  %v770_v17 = vmul.f32 -1.442695, %v664_v16 }
 0x435   : > { %903 = vpow2.f32 %v770_v17 }
 0x440   : > { %v902_v18 = vpop.eup %901 }
 0x441   : > { %v671_v19 = vadd.f32 1.0, %v902_v18 }
 0x442   : > { %v904_v20 = vpop.eup %903 }
 0x443   : > { %905 = vrcp.f32 %v671_v19  ;;  %v672_v21 = vadd.f32 1.0, %v904_v20 }
 0x445   : > { %907 = vrcp.f32 %v672_v21 }
 0x450   : > { %v906_v22 = vpop.eup %905 }
 0x451   : > { %v677_v23 = vmul.f32 %v906_v22, %v1259_v52 }
 0x452   : > { %v908_v24 = vpop.eup %907 }
 0x453   : > { %v678_v25 = vmul.f32 %v908_v24, %v1257_v51  ;;  %679 = vst [vmem:[%s217_s9] sm:$0xff] %v677_v23 }
 0x455   : > { %680 = vst [vmem:[%s217_s9 + $0x8] sm:$0xff] %v678_v25 }
 0x456   : > { %922 = shalt.err (!%p919_p3)
}
 0x457   : > { %s923_s23 = scalar_lea.hbm %s694_s13, 256  ;;  %s927_s30 = scalar_lea.hbm %s1353_s5, 512 }
 0x458   : > { %p924_p4 = scmp.ne.s32.totalorder %s694_s13, %s923_s23  ;;  %p928_p9 = scmp.lt.s32.totalorder %s694_s13, %s1353_s5 }
 0x459   : > { %p929_p10 = scmp.lt.s32.totalorder %s927_s30, %s923_s23 }
 0x45a   : > { %p925_p7 = pnand %p924_p4, %p1042_p5 }
 0x45b   : > { %p930_p11 = por %p929_p10, %p928_p9 }
 0x45c   : > { %p926_p8 = pneg %p925_p7 }
 0x45e   : > { %p931_p12 = pnand %p930_p11, %p926_p8 }
 0x460   : > { %934 = shalt.err (!%p931_p12)
}
 0x461   : > { %848 = dma.vmem_to_hbm [thread:$0]  (%p1042_p5), %s697_s10, 256, %s694_s13, %s682_s14  }
 0x462 PF: > { %p854_p13 = scmp.ge.s32.totalorder %s969_s21, 2  ;;  %s708_s8 = sand.u32 1, %s957_s18  }
 0x463   : > { %s709_s9 = scalar_lea.sflag [#allocation3], %s708_s8 }
 0x464   : > { %p851_p0 = pnand %p854_p13, %p1046_p6 }
 0x466   : > { %p852_p1 = pneg %p851_p0 }
 0x468   : > { %952 = dma.done.wait (%p852_p1), %s709_s9, 256  }
 0x469   : > { %954 = vsyncadd (%p852_p1), %s709_s9, 4294967040  ;;  %p15_p2 = scmp.ge.s32.totalorder %s1029_s24, 4   ;;  %s1356_s18 = smov %s961_s19 }
 0x46a   : > { %s1357_s19 = smov %s965_s20  ;;  %s1358_s20 = smov %s1040_s27 }
 0x46b   : > { %s1359_s21 = smov %s1029_s24  ;;  %17 = sbr.rel (!%p15_p2) target bundleno = 3 (0x3), region = 75 }
 0x470   :  { %714 = vsyncpa [#allocation3], 1 }
 0x471   :  { %716 = vsyncpa [#allocation3 + $0x1], 1 }

</bundles_post_ra>
